<compile_context>
chip_gen: v5e
topology: v5e:2x2
jax: 0.10.0
libtpu: 0.0.40
codegen_flags: <defaults>
</compile_context>

<pallas_src>
import math

import jax
import jax.numpy as jnp
from jax.experimental import pallas as pl
from jax.experimental.pallas import tpu as pltpu


# ----------------------------------------------------------------------------
# In-kernel math (shared by the 2-D row path and the 3-D folded path)
# ----------------------------------------------------------------------------

def _sum_per_image(x):
    """Sum over every axis except the leading (image) axis, keeping dims."""
    for ax in range(x.ndim - 1, 0, -1):   # lane axis first, then sublane axis
        x = jnp.sum(x, axis=ax, keepdims=True)
    return x


def _as_f32_mask(m_raw):
    if m_raw.dtype == jnp.bool_:
        return jnp.where(m_raw, jnp.float32(1.0), jnp.float32(0.0))
    return m_raw.astype(jnp.float32)


def _per_image_num_den(p, t, m):
    """Per-image (num, den) = (sum m*|scale*p + shift - t|, sum m)."""
    # Reuse masked products across the five Gram reductions.
    mp = m * p
    mt = m * t
    a_00 = _sum_per_image(mp * p)
    a_01 = _sum_per_image(mp)
    a_11 = _sum_per_image(m)
    b_0 = _sum_per_image(mp * t)
    b_1 = _sum_per_image(mt)

    # Vectorized 2x2 least-squares solve; scale/shift are 0 where det <= 0
    # (matches the torch reference).  Exact division (tiny arrays).
    det = a_00 * a_11 - a_01 * a_01
    valid = det > jnp.float32(0.0)
    safe_det = jnp.where(valid, det, jnp.float32(1.0))
    scale = jnp.where(valid, (a_11 * b_0 - a_01 * b_1) / safe_det, jnp.float32(0.0))
    shift = jnp.where(valid, (a_00 * b_1 - a_01 * b_0) / safe_det, jnp.float32(0.0))

    err = scale * p + shift - t
    num = _sum_per_image(m * jnp.abs(err))
    return num, a_11


def _make_kernel(batch, imgs_per_block):
    """Kernel for either block rank.

    Inputs:  (imgs_per_block, N)        -- 2-D row-per-image path, or
             (imgs_per_block, s, N//s)  -- 3-D sublane-folded path.
    Output:  (imgs_per_block, [1,] 128) -- num in lane 0, den in lane 1,
             zeros elsewhere (lane-dense, unmasked stores).
    Out-of-range images of a partial edge block are neutralized with a select
    (NOT multiply-by-zero) so garbage VMEM contents cannot poison anything.
    """

    def kernel(p_ref, t_ref, m_ref, out_ref):
        p = p_ref[...].astype(jnp.float32)
        t = t_ref[...].astype(jnp.float32)
        m = _as_f32_mask(m_ref[...])

        num, den = _per_image_num_den(p, t, m)          # (bi, 1[, 1])

        shape = out_ref.shape
        img = (pl.program_id(0) * imgs_per_block
               + jax.lax.broadcasted_iota(jnp.int32, shape, 0))
        lane = jax.lax.broadcasted_iota(jnp.int32, shape, len(shape) - 1)
        row_ok = img < batch                            # partial-edge-block guard
        out = jnp.where(row_ok & (lane == 0), num, jnp.float32(0.0))
        out = jnp.where(row_ok & (lane == 1), den, out)
        out_ref[...] = out

    return kernel


# ----------------------------------------------------------------------------
# pallas_call drivers
# ----------------------------------------------------------------------------

def _compiler_params(vmem_limit):
    return pltpu.CompilerParams(
        dimension_semantics=("parallel",),
        vmem_limit_bytes=int(vmem_limit),
    )


def _run_rows(p, t, m, batch, n, bt, vmem_limit):
    """2-D path: one image per sublane row, blocks of (bt, N)."""
    out = pl.pallas_call(
        _make_kernel(batch, bt),
        out_shape=jax.ShapeDtypeStruct((batch, 128), jnp.float32),
        grid_spec=pltpu.PrefetchScalarGridSpec(
            num_scalar_prefetch=0,
            grid=(pl.cdiv(batch, bt),),
            in_specs=[pl.BlockSpec((bt, n), lambda i: (i, 0))] * 3,
            out_specs=pl.BlockSpec((bt, 128), lambda i: (i, 0)),
        ),
        compiler_params=_compiler_params(vmem_limit),
    )(p, t, m)
    return out[:, 0], out[:, 1]


def _run_planes(p, t, m, batch, s, n_cols, bi, vmem_limit):
    """3-D fold path: (B, N) -> (B, s, N/s), blocks of (bi, s, N/s)."""
    p = p.reshape(batch, s, n_cols)   # row-major split of the trailing dim: free
    t = t.reshape(batch, s, n_cols)
    m = m.reshape(batch, s, n_cols)
    out = pl.pallas_call(
        _make_kernel(batch, bi),
        out_shape=jax.ShapeDtypeStruct((batch, 1, 128), jnp.float32),
        grid_spec=pltpu.PrefetchScalarGridSpec(
            num_scalar_prefetch=0,
            grid=(pl.cdiv(batch, bi),),
            in_specs=[pl.BlockSpec((bi, s, n_cols), lambda i: (i, 0, 0))] * 3,
            out_specs=pl.BlockSpec((bi, 1, 128), lambda i: (i, 0, 0)),
        ),
        compiler_params=_compiler_params(vmem_limit),
    )(p, t, m)
    return out[:, 0, 0], out[:, 0, 1]


# ----------------------------------------------------------------------------
# Wrapper (tiling policy + tiny final reduction)
# ----------------------------------------------------------------------------

_TEMP_F32_LIVE = 6  # rough count of live full-tile f32 temporaries in the body


def _vmem_capacity_bytes():
    try:
        cap = getattr(pltpu.get_tpu_info(), "vmem_capacity_bytes", None)
        if cap:
            return int(cap)
    except Exception:
        pass
    return 64 * 1024 * 1024   # conservative fallback (v7x per-TensorCore VMEM)


def _pick_fold_rows(n):
    """Smallest divisor of n usable as a sublane fold (>= 8); None if absent."""
    if n % 8 == 0:
        return 8
    for cand in range(9, min(n, 4096) + 1):
        if n % cand == 0:
            return cand
    return None


def _drop_channel(x):
    # torch's bare .squeeze() would also drop the batch dim when B == 1; keep
    # the batch axis explicit instead (shape-safe for B == 1).
    if x.ndim == 4:
        x = jnp.squeeze(x, axis=1)
    return x


def scale_and_shift_invariant_loss(prediction, target, mask, interpolate=True,
                                   return_interpolated=False, *,
                                   block_budget_bytes=None):
    """prediction/target: (B,1,H,W) or (B,H,W); mask: same shape, bool or {0,1}."""
    if prediction.shape[-1] != target.shape[-1] and interpolate:
        # TODO(synk): bilinear interpolation (align_corners=True) not implemented.
        raise NotImplementedError("interpolation branch not implemented")
    intr_input = prediction

    p = _drop_channel(prediction)
    t = _drop_channel(target)
    m = _drop_channel(mask)
    assert p.shape == t.shape, f"Shape mismatch: {p.shape} vs {t.shape}"
    assert p.shape == m.shape, f"Mask shape mismatch: {m.shape} vs {p.shape}"

    # bool -> uint8 is a 1-byte -> 1-byte pass kept only for Mosaic i1 safety;
    # float / integer masks stream through untouched in their native dtype.
    if m.dtype == jnp.bool_:
        m = m.astype(jnp.uint8)

    B = p.shape[0]
    N = math.prod(p.shape[1:])
    p = p.reshape(B, N)
    t = t.reshape(B, N)
    m = m.reshape(B, N)

    # ---- generation-aware sizing -------------------------------------------
    vmem_cap = _vmem_capacity_bytes()
    budget = int(block_budget_bytes) if block_budget_bytes is not None else int(0.4 * vmem_cap)
    vmem_limit = max(32 << 20, min(int(0.8 * vmem_cap), 100 << 20))

    io_bytes = p.dtype.itemsize + t.dtype.itemsize + m.dtype.itemsize
    # double-buffered input blocks + estimated live f32 temporaries in the body
    resident_per_elem = 2 * io_bytes + 4 * _TEMP_F32_LIVE
    per_image = N * resident_per_elem + 2 * 128 * 4
    imgs_by_budget = budget // per_image

    min_rows = min(8, B)
    fits_2d = min_rows * per_image <= budget

    if fits_2d:
        # --- 2-D path: images stacked across sublanes ------------------------
        bt = B if imgs_by_budget >= B else imgs_by_budget
        # soft cap ~8 MiB of streamed input per block
        bt = min(bt, max(8, (8 << 20) // max(1, N * io_bytes)))
        # keep >= ~2-4 grid steps so both v7x TensorCores get work
        if B > 8:
            bt = min(bt, max(8, pl.cdiv(B, 4)))
        bt = B if bt >= B else max(8, (bt // 8) * 8)
        num, den = _run_rows(p, t, m, B, N, bt, vmem_limit)
    else:
        s = _pick_fold_rows(N)
        if s is not None:
            # --- 3-D fold path: keep >= 8 sublanes per image -----------------
            n_cols = N // s
            bi = max(1, min(B, imgs_by_budget))
            num, den = _run_planes(p, t, m, B, s, n_cols, bi, vmem_limit)
        else:
            # TODO(synk): pathological N (no divisor >= 8); fall back to the
            # smallest legal 2-D block even though it overshoots the budget.
            bt = B if B <= 8 else 8
            num, den = _run_rows(p, t, m, B, N, bt, vmem_limit)

    # Global masked mean == F.l1_loss(scaled_prediction[mask], target[mask]).
    # (den == 0, i.e. a fully empty mask, yields NaN/Inf just like torch.)
    loss = jnp.sum(num) / jnp.sum(den)
    if return_interpolated:
        return loss, intr_input
    return loss


# ----------------------------------------------------------------------------
# Pure-JAX reference (replicates the torch forward pass) + self-test
# ----------------------------------------------------------------------------

def _reference_loss(prediction, target, mask):
    p = _drop_channel(prediction).astype(jnp.float32)
    t = _drop_channel(target).astype(jnp.float32)
    m = _drop_channel(mask).astype(jnp.float32)
    a_00 = jnp.sum(m * p * p, axis=(1, 2))
    a_01 = jnp.sum(m * p, axis=(1, 2))
    a_11 = jnp.sum(m, axis=(1, 2))
    b_0 = jnp.sum(m * p * t, axis=(1, 2))
    b_1 = jnp.sum(m * t, axis=(1, 2))
    det = a_00 * a_11 - a_01 * a_01
    valid = det > 0
    safe_det = jnp.where(valid, det, 1.0)
    x_0 = jnp.where(valid, (a_11 * b_0 - a_01 * b_1) / safe_det, 0.0)
    x_1 = jnp.where(valid, (-a_01 * b_0 + a_00 * b_1) / safe_det, 0.0)
    scaled = x_0[:, None, None] * p + x_1[:, None, None]
    return jnp.sum(m * jnp.abs(scaled - t)) / jnp.sum(m)


if __name__ == "__main__":
    key = jax.random.PRNGKey(0)
    keys = jax.random.split(key, 9)

    # Case 1: default path, small batch / small images, bool mask.
    B, C, H, W = 2, 1, 16, 16
    pred = jax.random.uniform(keys[0], (B, C, H, W), jnp.float32, 0.1, 10.0)
    targ = jax.random.uniform(keys[1], (B, C, H, W), jnp.float32, 0.1, 10.0)
    msk = jax.random.uniform(keys[2], (B, C, H, W), jnp.float32) > 0.3
    got = jax.block_until_ready(scale_and_shift_invariant_loss(pred, targ, msk))
    ref = jax.block_until_ready(_reference_loss(pred, targ, msk))
    assert jnp.allclose(got, ref, rtol=1e-5, atol=1e-5), ("case1", got, ref)

    # Case 2: batch > one 8-row block -> exercises the partial edge block path.
    B2 = 10
    pred2 = jax.random.uniform(keys[3], (B2, C, H, W), jnp.float32, 0.1, 10.0)
    targ2 = jax.random.uniform(keys[4], (B2, C, H, W), jnp.float32, 0.1, 10.0)
    msk2 = jax.random.uniform(keys[5], (B2, C, H, W), jnp.float32) > 0.3
    got2 = jax.block_until_ready(scale_and_shift_invariant_loss(pred2, targ2, msk2))
    ref2 = jax.block_until_ready(_reference_loss(pred2, targ2, msk2))
    assert jnp.allclose(got2, ref2, rtol=1e-5, atol=1e-5), ("case2", got2, ref2)

    # Case 3: force the sublane-fold (large-image) path via a tiny block budget;
    # also exercises a float {0,1} mask streamed in its native dtype and a
    # partial edge block on the folded layout.
    B3, H3, W3 = 5, 32, 32
    pred3 = jax.random.uniform(keys[6], (B3, 1, H3, W3), jnp.float32, 0.1, 10.0)
    targ3 = jax.random.uniform(keys[7], (B3, 1, H3, W3), jnp.float32, 0.1, 10.0)
    msk3 = (jax.random.uniform(keys[8], (B3, 1, H3, W3), jnp.float32) > 0.3).astype(jnp.float32)
    got3 = jax.block_until_ready(
        scale_and_shift_invariant_loss(pred3, targ3, msk3, block_budget_bytes=160 * 1024))
    ref3 = jax.block_until_ready(_reference_loss(pred3, targ3, msk3))
    assert jnp.allclose(got3, ref3, rtol=1e-5, atol=1e-5), ("case3", got3, ref3)

    print("KERNEL_OK")
</pallas_src>

<mosaic_0001>
module attributes {stable_mosaic.version = 11 : i64} {
  func.func @kernel(%arg0: i32, %arg1: memref<2x256xf32, #tpu.memory_space<vmem>>, %arg2: memref<2x256xf32, #tpu.memory_space<vmem>>, %arg3: memref<2x256xi8, #tpu.memory_space<vmem>>, %arg4: memref<2x128xf32, #tpu.memory_space<vmem>>) attributes {dimension_semantics = [#tpu.dimension_semantics<parallel>], iteration_bounds = array<i64: 1>, scalar_prefetch = 0 : i64, scratch_operands = 0 : i64, tpu.core_type = #tpu.core_type<tc>, window_params = [{transform_indices = @transform_0, window_bounds = array<i64: 2, 256>}, {transform_indices = @transform_1, window_bounds = array<i64: 2, 256>}, {transform_indices = @transform_2, window_bounds = array<i64: 2, 256>}, {transform_indices = @transform_3, window_bounds = array<i64: 2, 128>}]} {
    %c0 = arith.constant 0 : index
    %c0_0 = arith.constant 0 : index
    %0 = vector.load %arg1[%c0, %c0_0] : memref<2x256xf32, #tpu.memory_space<vmem>>, vector<2x256xf32>
    %c0_1 = arith.constant 0 : index
    %c0_2 = arith.constant 0 : index
    %1 = vector.load %arg2[%c0_1, %c0_2] : memref<2x256xf32, #tpu.memory_space<vmem>>, vector<2x256xf32>
    %c0_3 = arith.constant 0 : index
    %c0_4 = arith.constant 0 : index
    %2 = vector.load %arg3[%c0_3, %c0_4] : memref<2x256xi8, #tpu.memory_space<vmem>>, vector<2x256xi8>
    %3 = arith.uitofp %2 : vector<2x256xi8> to vector<2x256xf32>
    %4 = arith.mulf %3, %0 : vector<2x256xf32>
    %5 = arith.mulf %3, %1 : vector<2x256xf32>
    %6 = arith.mulf %4, %0 : vector<2x256xf32>
    %cst = arith.constant dense<0.000000e+00> : vector<2xf32>
    %7 = vector.multi_reduction <add>, %6, %cst [1] : vector<2x256xf32> to vector<2xf32>
    %8 = vector.shape_cast %7 : vector<2xf32> to vector<2x1xf32>
    %cst_5 = arith.constant dense<0.000000e+00> : vector<2xf32>
    %9 = vector.multi_reduction <add>, %4, %cst_5 [1] : vector<2x256xf32> to vector<2xf32>
    %10 = vector.shape_cast %9 : vector<2xf32> to vector<2x1xf32>
    %cst_6 = arith.constant dense<0.000000e+00> : vector<2xf32>
    %11 = vector.multi_reduction <add>, %3, %cst_6 [1] : vector<2x256xf32> to vector<2xf32>
    %12 = vector.shape_cast %11 : vector<2xf32> to vector<2x1xf32>
    %13 = arith.mulf %4, %1 : vector<2x256xf32>
    %cst_7 = arith.constant dense<0.000000e+00> : vector<2xf32>
    %14 = vector.multi_reduction <add>, %13, %cst_7 [1] : vector<2x256xf32> to vector<2xf32>
    %15 = vector.shape_cast %14 : vector<2xf32> to vector<2x1xf32>
    %cst_8 = arith.constant dense<0.000000e+00> : vector<2xf32>
    %16 = vector.multi_reduction <add>, %5, %cst_8 [1] : vector<2x256xf32> to vector<2xf32>
    %17 = vector.shape_cast %16 : vector<2xf32> to vector<2x1xf32>
    %18 = arith.mulf %8, %12 : vector<2x1xf32>
    %19 = arith.mulf %10, %10 : vector<2x1xf32>
    %20 = arith.subf %18, %19 : vector<2x1xf32>
    %cst_9 = arith.constant 0.000000e+00 : f32
    %21 = vector.broadcast %cst_9 : f32 to vector<2x1xf32>
    %22 = arith.cmpf ogt, %20, %21 : vector<2x1xf32>
    %cst_10 = arith.constant 1.000000e+00 : f32
    %23 = vector.broadcast %cst_10 : f32 to vector<2x1xf32>
    %24 = arith.select %22, %20, %23 : vector<2x1xi1>, vector<2x1xf32>
    %25 = arith.mulf %12, %15 : vector<2x1xf32>
    %26 = arith.mulf %10, %17 : vector<2x1xf32>
    %27 = arith.subf %25, %26 : vector<2x1xf32>
    %28 = arith.divf %27, %24 : vector<2x1xf32>
    %cst_11 = arith.constant 0.000000e+00 : f32
    %29 = vector.broadcast %cst_11 : f32 to vector<2x1xf32>
    %30 = arith.select %22, %28, %29 : vector<2x1xi1>, vector<2x1xf32>
    %31 = arith.mulf %8, %17 : vector<2x1xf32>
    %32 = arith.mulf %10, %15 : vector<2x1xf32>
    %33 = arith.subf %31, %32 : vector<2x1xf32>
    %34 = arith.divf %33, %24 : vector<2x1xf32>
    %cst_12 = arith.constant 0.000000e+00 : f32
    %35 = vector.broadcast %cst_12 : f32 to vector<2x1xf32>
    %36 = arith.select %22, %34, %35 : vector<2x1xi1>, vector<2x1xf32>
    %37 = vector.broadcast %30 : vector<2x1xf32> to vector<2x256xf32>
    %38 = arith.mulf %37, %0 : vector<2x256xf32>
    %39 = vector.broadcast %36 : vector<2x1xf32> to vector<2x256xf32>
    %40 = arith.addf %38, %39 : vector<2x256xf32>
    %41 = arith.subf %40, %1 : vector<2x256xf32>
    %42 = math.absf %41 : vector<2x256xf32>
    %43 = arith.mulf %3, %42 : vector<2x256xf32>
    %cst_13 = arith.constant dense<0.000000e+00> : vector<2xf32>
    %44 = vector.multi_reduction <add>, %43, %cst_13 [1] : vector<2x256xf32> to vector<2xf32>
    %45 = vector.shape_cast %44 : vector<2xf32> to vector<2x1xf32>
    %c2_i32 = arith.constant 2 : i32
    %46 = arith.muli %arg0, %c2_i32 : i32
    %47 = tpu.iota {dimensions = array<i32: 0>} : vector<2x128xi32>
    %48 = vector.broadcast %46 : i32 to vector<2x128xi32>
    %49 = arith.addi %48, %47 : vector<2x128xi32>
    %50 = tpu.iota {dimensions = array<i32: 1>} : vector<2x128xi32>
    %c2_i32_14 = arith.constant 2 : i32
    %51 = vector.broadcast %c2_i32_14 : i32 to vector<2x128xi32>
    %52 = arith.cmpi slt, %49, %51 : vector<2x128xi32>
    %c0_i32 = arith.constant 0 : i32
    %53 = vector.broadcast %c0_i32 : i32 to vector<2x128xi32>
    %54 = arith.cmpi eq, %50, %53 : vector<2x128xi32>
    %55 = arith.andi %52, %54 : vector<2x128xi1>
    %cst_15 = arith.constant 0.000000e+00 : f32
    %56 = vector.shape_cast %45 : vector<2x1xf32> to vector<2x1xf32>
    %57 = vector.broadcast %56 : vector<2x1xf32> to vector<2x128xf32>
    %58 = vector.broadcast %cst_15 : f32 to vector<2x128xf32>
    %59 = arith.select %55, %57, %58 : vector<2x128xi1>, vector<2x128xf32>
    %c1_i32 = arith.constant 1 : i32
    %60 = vector.broadcast %c1_i32 : i32 to vector<2x128xi32>
    %61 = arith.cmpi eq, %50, %60 : vector<2x128xi32>
    %62 = arith.andi %52, %61 : vector<2x128xi1>
    %63 = vector.shape_cast %12 : vector<2x1xf32> to vector<2x1xf32>
    %64 = vector.broadcast %63 : vector<2x1xf32> to vector<2x128xf32>
    %65 = arith.select %62, %64, %59 : vector<2x128xi1>, vector<2x128xf32>
    %c0_16 = arith.constant 0 : index
    %c0_17 = arith.constant 0 : index
    %66 = vector.load %arg4[%c0_16, %c0_17] : memref<2x128xf32, #tpu.memory_space<vmem>>, vector<2x128xf32>
    tpu.vector_store %arg4[%c0_16, %c0_17], %65 {strides = array<i32>} : memref<2x128xf32, #tpu.memory_space<vmem>>, vector<2x128xf32>,
    return
  }
  func.func @transform_0(%arg0: i32) -> (i32, i32) {
    %c0_i32 = arith.constant 0 : i32
    %c0_i32_0 = arith.constant 0 : i32
    return %arg0, %c0_i32 : i32, i32
  }
  func.func @transform_1(%arg0: i32) -> (i32, i32) {
    %c0_i32 = arith.constant 0 : i32
    %c0_i32_0 = arith.constant 0 : i32
    return %arg0, %c0_i32 : i32, i32
  }
  func.func @transform_2(%arg0: i32) -> (i32, i32) {
    %c0_i32 = arith.constant 0 : i32
    %c0_i32_0 = arith.constant 0 : i32
    return %arg0, %c0_i32 : i32, i32
  }
  func.func @transform_3(%arg0: i32) -> (i32, i32) {
    %c0_i32 = arith.constant 0 : i32
    %c0_i32_0 = arith.constant 0 : i32
    return %arg0, %c0_i32 : i32, i32
  }
}

</mosaic_0001>

<bundles_post_ra>
// kernel: tpu_custom_call.1
= control target key start
LH: loop header
LB: loop body
LE: loop exit
PB: predicated region body
PF: predicated region fallthrough
CT: control target
= control target key end

     0   :  { %8 = vsyncpa [#allocation3], 0  ;;  %s404_s0 = inlined_call_operand.hbm [shape: f32[2,256], index: 0, kind: input, shape index: {}]   ;;  %s405_s1 = inlined_call_operand.hbm [shape: f32[2,256], index: 1, kind: input, shape index: {}]   ;;  %s406_s2 = inlined_call_operand.hbm [shape: u8[2,256], index: 2, kind: input, shape index: {}]   ;;  %s407_s3 = inlined_call_operand.hbm [shape: f32[2,128], index: 3, kind: output, shape index: {}]  }
   0x1   :  { %9 = vsyncpa [#allocation6], 0  ;;  %s27_s14 = sshll.u32 %s405_s1, 4  ;;  %s28_s14 = int_to_ptr.hbm [resolvable:$true] %s27_s14 }
   0x2   :  { %10 = vsyncpa [#allocation4], 0  ;;  %s342_s15 = smov [#allocation5]   ;;  %s16_s19 = sshll.u32 %s404_s0, 4  ;;  %s17_s19 = int_to_ptr.hbm [resolvable:$true] %s16_s19 }
   0x3   :  { %s29_s16 = sshll.u32 %s342_s15, 4  ;;  %s343_s20 = smov [#allocation2]   ;;  %s30_s16 = int_to_ptr.vmem [resolvable:$true] %s29_s16 }
   0x4   :  { %32 = dma.hbm_to_vmem [thread:$0]  %s28_s14, 64, %s30_s16, [#allocation6]  }
   0x5   :  { %s18_s21 = sshll.u32 %s343_s20, 4  ;;  %s38_s24 = sshll.u32 %s406_s2, 4  ;;  %s19_s21 = int_to_ptr.vmem [resolvable:$true] %s18_s21  ;;  %s39_s24 = int_to_ptr.hbm [resolvable:$true] %s38_s24 }
   0x6   :  { %21 = dma.hbm_to_vmem [thread:$0]  %s17_s19, 64, %s19_s21, [#allocation3]  }
   0x7   :  { %s344_s1 = smov [#allocation7]  }
   0x8   :  { %s40_s25 = sshll.u32 %s344_s1, 4  ;;  %s41_s25 = int_to_ptr.vmem [resolvable:$true] %s40_s25 }
   0x9   :  { %43 = dma.hbm_to_vmem [thread:$0]  %s39_s24, 32, %s41_s25, [#allocation6]  }
   0xa   :  { %336 = dma.done.wait [#allocation3], 64  }
   0xb   :  { %337 = vsyncadd [#allocation3], 4294967232 }
   0xc   :  { %338 = dma.done.wait [#allocation6], 96  }
   0xd   :  { %339 = vsyncadd [#allocation6], 4294967200  ;;  %v56_v0 = vld [vmem:[#allocation2] sm:$0xf]  ;;  %v57_v1 = vld [vmem:[#allocation5] sm:$0xf] }
   0xe   :  { %63 = vst [vmem:[#allocation1] ss:$2 sm:$0xff] %v56_v0  ;;  %v58_v2 = vld [vmem:[#allocation7] sm:$0x3]  ;;  %vm82_vm0 = vcmask 1041408   ;;  %vm186_vm6 = vcmask 1043456  }
   0xf   :  { %v59_v4 = vunpack.c.0.s8 %v58_v2  ;;  %s345_s0 = smov [#allocation8]   ;;  %s223_s28 = sshll.u32 %s407_s3, 4  ;;  %s224_s28 = int_to_ptr.hbm [resolvable:$true] %s223_s28 }
  0x10   :  { %s221_s2 = sshll.u32 %s345_s0, 4  ;;  %s222_s2 = int_to_ptr.vmem [resolvable:$true] %s221_s2 }
  0x11   :  { %v60_v5 = vand.u32 255, %v59_v4 }
  0x13   :  { %v375_v7 = vcvt.s32.f32 %v60_v5 }
  0x15   :  { %v64_v3 = vld.sshfl [vmem:[#allocation1] sm:$0xff pattern:$0x75643120] }
  0x16   :  { %68 = vst [vmem:[#allocation1] ss:$2 sm:$0xff] %v57_v1  ;;  %v66_v8 = vmul.f32 %v64_v3, %v375_v7 }
  0x1d   :  { %v69_v6 = vld.sshfl [vmem:[#allocation1] sm:$0xff pattern:$0x75643120] }
  0x1e   :  { %72 = vst [vmem:[#allocation1] ss:$2 sm:$0xff] %v56_v0  ;;  %v71_v28 = vmul.f32 %v69_v6, %v375_v7 }
  0x25   :  { %v73_v9 = vld.sshfl [vmem:[#allocation1] sm:$0xff pattern:$0x75643120] }
  0x26   :  { %v75_v10 = vmul.f32 %v73_v9, %v66_v8 }
  0x28   :  { %77 = vst [vmem:[#allocation1] ss:$2 sm:$0xff] %v75_v10 }
  0x2f   :  { %v78_v11 = vld.sshfl [vmem:[#allocation1] sm:$0xff pattern:$0x75316420]  ;;  %v79_v12 = vld.sshfl [vmem:[#allocation1 + $0x8] sm:$0xff pattern:$0x75316420] }
  0x30   :  { %v83_v13 = vsel %vm82_vm0, %v78_v11, 0.0  ;;  %v84_v14 = vsel %vm82_vm0, %v79_v12, 0.0  ;;  %89 = vst [vmem:[#allocation1] ss:$2 sm:$0xff] %v66_v8 }
  0x31   :  { %v85_v15 = vadd.f32 %v84_v14, %v83_v13 }
  0x33   :  { %86 = vadd.xlane.f32.xlu0 %v85_v15 }
  0x37   :  { %v90_v16 = vld.sshfl [vmem:[#allocation1] sm:$0xff pattern:$0x75316420]  ;;  %v91_v17 = vld.sshfl [vmem:[#allocation1 + $0x8] sm:$0xff pattern:$0x75316420] }
  0x38   :  { %100 = vst [vmem:[#allocation1] ss:$2 sm:$0xff] %v375_v7  ;;  %v94_v18 = vsel %vm82_vm0, %v90_v16, 0.0  ;;  %v95_v19 = vsel %vm82_vm0, %v91_v17, 0.0 }
  0x39   :  { %v96_v20 = vadd.f32 %v95_v19, %v94_v18 }
  0x3b   :  { %97 = vadd.xlane.f32.xlu0 %v96_v20 }
  0x3f   :  { %v101_v21 = vld.sshfl [vmem:[#allocation1] sm:$0xff pattern:$0x75316420]  ;;  %v102_v22 = vld.sshfl [vmem:[#allocation1 + $0x8] sm:$0xff pattern:$0x75316420] }
  0x40   :  { %v105_v23 = vsel %vm82_vm0, %v101_v21, 0.0  ;;  %v106_v24 = vsel %vm82_vm0, %v102_v22, 0.0  ;;  %110 = vst [vmem:[#allocation1] ss:$2 sm:$0xff] %v57_v1 }
  0x41   :  { %v107_v25 = vadd.f32 %v106_v24, %v105_v23 }
  0x43   :  { %108 = vadd.xlane.f32.xlu1 %v107_v25  ;;  %v202_v25 = vlaneseq }
  0x47   :  { %v111_v26 = vld.sshfl [vmem:[#allocation1] sm:$0xff pattern:$0x75643120] }
  0x48   :  { %v113_v27 = vmul.f32 %v111_v26, %v66_v8  ;;  %v203_v26 = vshrl.u32 %v202_v25, 7 }
  0x4a   :  { %115 = vst [vmem:[#allocation1] ss:$2 sm:$0xff] %v113_v27  ;;  %v207_v27 = vand.u32 127, %v202_v25  ;;  %vm208_vm7 = vcmp.lt.s32.totalorder %v203_v26, 2 }
  0x4c   :  { %vm209_vm8 = vcmp.eq.s32.totalorder %v207_v27, 0  ;;  %vm212_vm9 = vcmp.eq.s32.totalorder %v207_v27, 1 }
  0x4d   :  { %vm210_vm10 = vmand %vm208_vm7, %vm209_vm8 }
  0x4e   :  { %vm213_vm11 = vmand %vm208_vm7, %vm212_vm9 }
  0x51   :  { %v116_v29 = vld.sshfl [vmem:[#allocation1] sm:$0xff pattern:$0x75316420]  ;;  %v117_v30 = vld.sshfl [vmem:[#allocation1 + $0x8] sm:$0xff pattern:$0x75316420] }
  0x52   :  { %v120_v31 = vsel %vm82_vm0, %v116_v29, 0.0  ;;  %v121_v32 = vsel %vm82_vm0, %v117_v30, 0.0  ;;  %126 = vst [vmem:[#allocation1] ss:$2 sm:$0xff] %v71_v28 }
  0x53   :  { %v122_v33 = vadd.f32 %v121_v32, %v120_v31 }
  0x55   :  { %123 = vadd.xlane.f32.xlu1 %v122_v33 }
  0x59   :  { %v127_v34 = vld.sshfl [vmem:[#allocation1] sm:$0xff pattern:$0x75316420]  ;;  %v128_v35 = vld.sshfl [vmem:[#allocation1 + $0x8] sm:$0xff pattern:$0x75316420] }
  0x5a   :  { %v131_v36 = vsel %vm82_vm0, %v127_v34, 0.0  ;;  %v132_v37 = vsel %vm82_vm0, %v128_v35, 0.0  ;;  %165 = vst [vmem:[#allocation1] ss:$4 sm:$0xff] %v56_v0 }
  0x5b   :  { %v133_v38 = vadd.f32 %v132_v37, %v131_v36 }
  0x5d   :  { %134 = vadd.xlane.f32.xlu2 %v133_v38 }
  0x61   :  { %v166_v40 = vld.sshfl [vmem:[#allocation1] sm:$0xff pattern:$0x73625140]  ;;  %v167_v41 = vld.sshfl [vmem:[#allocation1 + $0x8] sm:$0xff pattern:$0x73625140] }
  0x62   :  { %174 = vst [vmem:[#allocation1] ss:$4 sm:$0xff] %v57_v1 }
  0x69   :  { %v175_v5 = vld.sshfl [vmem:[#allocation1] sm:$0xff pattern:$0x73625140]  ;;  %v176_v9 = vld.sshfl [vmem:[#allocation1 + $0x8] sm:$0xff pattern:$0x73625140] }
  0xa6   :  { %v87_v39 = vpop.xlane.xlu0 %86 }
  0xae   :  { %v98_v42 = vpop.xlane.xlu0 %97 }
  0xaf   :  { %v137_v43 = vmul.f32 %v98_v42, %v98_v42 }
  0xb6   :  { %v390_v44 = vpop.xlane.xlu1 %108 }
  0xb7   :  { %v136_v45 = vmul.f32 %v390_v44, %v87_v39 }
  0xb9   :  { %v138_v46 = vsub.f32 %v136_v45, %v137_v43 }
  0xbb   :  { %vm139_vm1 = vcmp.gt.f32.partialorder %v138_v46, 0.0 }
  0xbc   :  { %v140_v47 = vsel %vm139_vm1, %v138_v46, 1.0 }
  0xbd   :  { %238 = vrcp.f32 %v140_v47  ;;  %v155_v54 = vand.u32 2147483648, %v140_v47  ;;  %vm149_vm3 = vweird.f32 %v140_v47  ;;  %v153_v55 = vand.u32 2147483647, %v140_v47 }
  0xbf   :  { %v156_v62 = vor.u32 1.1754944e-38, %v155_v54  ;;  %vm154_vm5 = vcmp.eq.f32.partialorder %v153_v55, 8.507059e+37 }
  0xc3   :  { %v239_v48 = vpop.eup %238 }
  0xc4   :  { %v145_v49 = vmul.f32 %v239_v48, %v140_v47  ;;  %vm150_vm2 = vweird.f32 %v239_v48 }
  0xc5   :  { %vm151_vm4 = vmor %vm149_vm3, %vm150_vm2 }
  0xc6   :  { %v146_v50 = vsub.f32 1.0, %v145_v49 }
  0xc8   :  { %v147_v51 = vmul.f32 %v239_v48, %v146_v50  ;;  %v124_v52 = vpop.xlane.xlu1 %123 }
  0xc9   :  { %v141_v56 = vmul.f32 %v124_v52, %v390_v44  ;;  %v161_v58 = vmul.f32 %v124_v52, %v98_v42 }
  0xca   :  { %v148_v53 = vadd.f32 %v239_v48, %v147_v51 }
  0xcc   :  { %v152_v60 = vsel %vm151_vm4, %v239_v48, %v148_v53 }
  0xcd   :  { %v157_v1 = vsel %vm154_vm5, %v156_v62, %v152_v60 }
  0xd0   :  { %v135_v57 = vpop.xlane.xlu2 %134 }
  0xd1   :  { %v142_v59 = vmul.f32 %v135_v57, %v98_v42  ;;  %v160_v61 = vmul.f32 %v135_v57, %v87_v39 }
  0xd3   :  { %v143_v63 = vsub.f32 %v141_v56, %v142_v59  ;;  %v162_v0 = vsub.f32 %v160_v61, %v161_v58 }
  0xd5   :  { %v158_v2 = vmul.f32 %v157_v1, %v143_v63  ;;  %v163_v3 = vmul.f32 %v162_v0, %v157_v1 }
  0xd7   :  { %v159_v4 = vsel %vm139_vm1, %v158_v2, 0.0  ;;  %v164_v10 = vsel %vm139_vm1, %v163_v3, 0.0 }
  0xd8   :  { %v170_v6 = vmul.f32 %v166_v40, %v159_v4  ;;  %v171_v8 = vmul.f32 %v167_v41, %v159_v4 }
  0xda   :  { %v172_v11 = vadd.f32 %v170_v6, %v164_v10  ;;  %v173_v12 = vadd.f32 %v171_v8, %v164_v10 }
  0xdc   :  { %v179_v13 = vsub.f32 %v172_v11, %v175_v5  ;;  %v180_v14 = vsub.f32 %v173_v12, %v176_v9 }
  0xde   :  { %v182_v15 = vand.u32 2147483647, %v180_v14  ;;  %v181_v16 = vand.u32 2147483647, %v179_v13 }
  0xe0   :  { %v185_v17 = vrot.slane %v182_v15, 4 }
  0xe2   :  { %v187_v18 = vsel %vm186_vm6, %v181_v16, %v185_v17 }
  0xe3   :  { %v189_v19 = vmul.f32 %v187_v18, %v375_v7 }
  0xe5   :  { %191 = vst [vmem:[#allocation1] ss:$2 sm:$0xff] %v189_v19 }
  0xec   :  { %v192_v20 = vld.sshfl [vmem:[#allocation1] sm:$0xff pattern:$0x75316420]  ;;  %v193_v21 = vld.sshfl [vmem:[#allocation1 + $0x8] sm:$0xff pattern:$0x75316420] }
  0xed   :  { %v196_v22 = vsel %vm82_vm0, %v192_v20, 0.0  ;;  %v197_v23 = vsel %vm82_vm0, %v193_v21, 0.0 }
  0xee   :  { %v198_v24 = vadd.f32 %v197_v23, %v196_v22 }
  0xf0   :  { %199 = vadd.xlane.f32.xlu2 %v198_v24 }
 0x163   :  { %v200_v7 = vpop.xlane.xlu2 %199 }
 0x164   :  { %v211_v28 = vsel %vm210_vm10, %v200_v7, 0.0 }
 0x165   :  { %v214_v29 = vsel %vm213_vm11, %v390_v44, %v211_v28 }
 0x166   :  { %215 = vst [vmem:[#allocation8] sm:$0x3] %v214_v29 }
 0x167   :  { %226 = dma.vmem_to_hbm [thread:$0]  %s222_s2, 32, %s224_s28, [#allocation4]  }
 0x168   :  { %340 = dma.done.wait [#allocation4], 32  }
 0x169   :  { %341 = vsyncadd [#allocation4], 4294967264 }
 0x16a   :  { %231 = vsyncpa [#allocation3], 1 }
 0x16b   :  { %232 = vsyncpa [#allocation6], 1 }
 0x16c   :  { %233 = vsyncpa [#allocation4], 1 }

</bundles_post_ra>
